<compile_context>
chip_gen: v5e
topology: v5e:2x2
jax: 0.10.0
libtpu: 0.0.40
codegen_flags: <defaults>
</compile_context>

<pallas_src>
import functools

import jax
import jax.numpy as jnp
import numpy as np
from jax.experimental import pallas as pl
from jax.experimental.pallas import tpu as pltpu


def _round_up(x, m):
    return (x + m - 1) // m * m


# ----------------------------------------------------------------------------- kernel
def _fpn_predictor_kernel(c_pad, x_ref, w_all_ref, b_all_ref, scores_ref, bbox_ref):
    """Fused FPNPredictor forward for one tile of TILE_N ROIs.

      y      = x @ W_all + b_all        (TILE_N, P_pad)  f32 accumulation
               columns: [cls(1) | cls_score(C-1) | 0..C_pad | bbox(B) | 0..B_pad]
      scores = y[:, :C_pad]             lane-aligned slice, unmasked store
      bbox   = y[:, C_pad:]             lane-aligned slice, unmasked store
    """
    y = jnp.dot(x_ref[...], w_all_ref[...],
                preferred_element_type=jnp.float32) + b_all_ref[...]
    scores_ref[...] = y[:, :c_pad]
    bbox_ref[...] = y[:, c_pad:]


# ----------------------------------------------------------------------------- packing
def pack_params(params, *, scale=1.0, training=False, compute_dtype=jnp.bfloat16):
    """One-time (per-model, per-mode) packing: normalize sem_matrix, fold it into the sem
    weights, pre-transpose everything into a single lane-padded (K, N) weight slab.

    NOTE: TEST_SCALE / normalization and training-vs-eval are baked in here; re-pack when
    toggling modes or updating sem_matrix.
    """
    w_cls = params["w_cls"]                       # (1, D)
    b_cls = params["b_cls"].reshape(-1)           # (1,)
    w_sem = params["w_sem"]                       # (F, D)
    b_sem = params["b_sem"].reshape(-1)           # (F,)
    w_bbox = params["w_bbox"]                     # (B, D)
    b_bbox = params["b_bbox"].reshape(-1)         # (B,)
    sm = params["sem_matrix"]                     # (C-1, F)

    d = w_cls.shape[1]
    f = w_sem.shape[0]
    b = w_bbox.shape[0]
    c = sm.shape[0] + 1

    d_pad = _round_up(d, 128)
    c_pad = _round_up(c, 128)
    b_pad = _round_up(b, 128)
    p_pad = c_pad + b_pad

    # F.normalize(sem_matrix, p=2, dim=1)  (+ eval-time TEST_SCALE)
    norm = jnp.sqrt(jnp.sum(sm * sm, axis=1, keepdims=True))
    sm_n = sm / jnp.maximum(norm, 1e-12)
    if not training:
        sm_n = scale * sm_n

    # Fold the semantic projection into the linear layer (f32, then cast once to bf16).
    w_scores = jnp.dot(w_sem.T, sm_n.T)           # (D, C-1)
    b_scores = jnp.dot(b_sem, sm_n.T)             # (C-1,)

    # Fused, pre-transposed (K, N) weight slab; bbox block starts at a 128-aligned column.
    w_all = jnp.zeros((d_pad, p_pad), jnp.float32)
    w_all = w_all.at[:d, 0:1].set(w_cls.T)
    w_all = w_all.at[:d, 1:c].set(w_scores)
    w_all = w_all.at[:d, c_pad:c_pad + b].set(w_bbox.T)
    w_all = w_all.astype(compute_dtype)

    b_all = jnp.zeros((1, p_pad), jnp.float32)
    b_all = b_all.at[0, 0].set(b_cls[0])
    b_all = b_all.at[0, 1:c].set(b_scores)
    b_all = b_all.at[0, c_pad:c_pad + b].set(b_bbox)

    return dict(w_all=w_all, b_all=b_all,
                D=d, D_pad=d_pad, C=c, C_pad=c_pad, B=b, B_pad=b_pad, P_pad=p_pad,
                compute_dtype=compute_dtype)


# ----------------------------------------------------------------------------- wrapper
def fpn_predictor_forward(x, packed, *, tile_n=512):
    """Mirrors FPNPredictor.forward (get_feature=False) -> (scores, bbox_deltas)."""
    # TODO(synk): the `if self.get_feature: return sem` config path is incompatible with the
    # sem-matrix fold (sem is never materialized); use an unfused variant for that mode.
    if x.ndim == 4:
        assert x.shape[2] == 1 and x.shape[3] == 1
        x = x.reshape(x.shape[0], -1)
    n, d = x.shape
    assert d == packed["D"]

    d_pad = packed["D_pad"]
    c_out = packed["C"]
    c_pad = packed["C_pad"]
    b_out = packed["B"]
    b_pad = packed["B_pad"]
    p_pad = packed["P_pad"]
    cdt = packed["compute_dtype"]

    # --- ROI tiling ---------------------------------------------------------
    # bf16 packs 16 sublanes per vreg -> round the minimum tile to 16 rows.
    n16 = _round_up(max(n, 1), 16)
    tile_n = max(16, min(tile_n, n16))
    # Keep >= 2 grid steps for large batches so v7x's two TensorCores both get work.
    if n16 <= tile_n and n16 > 256:
        tile_n = _round_up((n16 + 1) // 2, 16)
    n_pad = _round_up(n16, tile_n)
    grid = (n_pad // tile_n,)

    # --- input cast / pad (skipped entirely when already in the right form) --
    x_p = x if x.dtype == cdt else x.astype(cdt)
    if (n_pad, d_pad) != (n, d):
        x_p = jnp.pad(x_p, ((0, n_pad - n), (0, d_pad - d)))

    # --- generation-aware VMEM budget ----------------------------------------
    itemsize = jnp.dtype(cdt).itemsize
    vmem_needed = (2 * tile_n * d_pad * itemsize          # x tile, double-buffered
                   + 2 * d_pad * p_pad * itemsize         # fused weights (resident)
                   + 2 * p_pad * 4                        # fused bias (resident)
                   + 2 * tile_n * (c_pad + b_pad) * 4     # output tiles, double-buffered
                   + tile_n * p_pad * 4)                  # y intermediate
    # Cap at 48 MiB: safe under v7x's 64 MiB-per-TC as well as v5e/v6e's 128 MiB.
    vmem_limit = int(min(max(2 * vmem_needed, 16 << 20), 48 << 20))

    flops = 2 * n_pad * d_pad * p_pad
    bytes_accessed = (x_p.size * x_p.dtype.itemsize
                      + packed["w_all"].size * packed["w_all"].dtype.itemsize
                      + packed["b_all"].size * 4
                      + n_pad * c_pad * 4
                      + n_pad * b_pad * 4)

    kernel = functools.partial(_fpn_predictor_kernel, c_pad)

    scores_p, bbox_p = pl.pallas_call(
        kernel,
        out_shape=(
            jax.ShapeDtypeStruct((n_pad, c_pad), jnp.float32),
            jax.ShapeDtypeStruct((n_pad, b_pad), jnp.float32),
        ),
        grid=grid,
        in_specs=[
            pl.BlockSpec((tile_n, d_pad), lambda i: (i, 0)),   # x tile (pipelined)
            pl.BlockSpec((d_pad, p_pad), lambda i: (0, 0)),    # fused weights (resident)
            pl.BlockSpec((1, p_pad), lambda i: (0, 0)),        # fused bias (resident)
        ],
        out_specs=(
            pl.BlockSpec((tile_n, c_pad), lambda i: (i, 0)),
            pl.BlockSpec((tile_n, b_pad), lambda i: (i, 0)),
        ),
        compiler_params=pltpu.CompilerParams(
            dimension_semantics=("parallel",),                 # megacore sharding on v7x
            vmem_limit_bytes=vmem_limit),
        cost_estimate=pl.CostEstimate(flops=flops, transcendentals=0,
                                      bytes_accessed=bytes_accessed),
    )(x_p, packed["w_all"], packed["b_all"])

    return scores_p[:n, :c_out], bbox_p[:n, :b_out]


# ----------------------------------------------------------------------------- params / references
def init_params(key, in_channels, num_classes, feature_size, cls_agnostic_bbox_reg=False):
    """Deterministic synthetic parameters matching FPNPredictor.__init__ shapes."""
    num_bbox_reg_classes = 2 if cls_agnostic_bbox_reg else num_classes
    k1, k2, k3, k4 = jax.random.split(key, 4)
    return {
        "w_cls": 0.01 * jax.random.normal(k1, (1, in_channels), jnp.float32),
        "b_cls": jnp.zeros((1, 1), jnp.float32),
        "w_sem": 0.01 * jax.random.normal(k2, (feature_size, in_channels), jnp.float32),
        "b_sem": jnp.zeros((1, feature_size), jnp.float32),
        "w_bbox": 0.001 * jax.random.normal(k3, (num_bbox_reg_classes * 4, in_channels),
                                            jnp.float32),
        "b_bbox": jnp.zeros((1, num_bbox_reg_classes * 4), jnp.float32),
        "sem_matrix": jax.random.normal(k4, (num_classes - 1, feature_size), jnp.float32),
    }


def _reference_folded(x, packed):
    """Order-matched reference: same packed bf16 slab, plain XLA matmul (tight tolerance)."""
    if x.ndim == 4:
        x = x.reshape(x.shape[0], -1)
    n, d = x.shape
    xc = x.astype(packed["compute_dtype"])
    xp = jnp.pad(xc, ((0, 0), (0, packed["D_pad"] - d)))
    y = jnp.dot(xp, packed["w_all"], preferred_element_type=jnp.float32) + packed["b_all"]
    return y[:, :packed["C"]], y[:, packed["C_pad"]:packed["C_pad"] + packed["B"]]


def _reference_f32(x, params, scale, training):
    """Original (un-fused, torch-order) math in f32 — loose semantic check."""
    if x.ndim == 4:
        x = x.reshape(x.shape[0], -1)
    b_score = x @ params["w_cls"].T + params["b_cls"].reshape(1, -1)
    sem = x @ params["w_sem"].T + params["b_sem"].reshape(1, -1)
    sm = params["sem_matrix"]
    sm_n = sm / jnp.maximum(jnp.linalg.norm(sm, axis=1, keepdims=True), 1e-12)
    if not training:
        sm_n = scale * sm_n
    cls_score = sem @ sm_n.T
    scores = jnp.concatenate([b_score, cls_score], axis=1)
    bbox = x @ params["w_bbox"].T + params["b_bbox"].reshape(1, -1)
    return scores, bbox


# ----------------------------------------------------------------------------- demo
if __name__ == "__main__":
    # Small, forward-consistent shapes:
    #   batch N=8, in_channels (representation_size) D=32,
    #   num_classes C=9 (sem_matrix has 8 rows), feature_size F=16,
    #   CLS_AGNOSTIC_BBOX_REG=False -> bbox output = 4*C = 36, TEST_SCALE=4.0, eval mode.
    N, D, C, F = 8, 32, 9, 16
    scale = 4.0

    key = jax.random.PRNGKey(0)
    kp, kx = jax.random.split(key)
    params = init_params(kp, in_channels=D, num_classes=C, feature_size=F)
    packed = pack_params(params, scale=scale, training=False, compute_dtype=jnp.bfloat16)

    # 4-D roi-pooled features (N, D, 1, 1) like the PyTorch head output.
    x = jax.random.normal(kx, (N, D, 1, 1), jnp.float32)

    scores, bbox_deltas = fpn_predictor_forward(x, packed)
    jax.block_until_ready((scores, bbox_deltas))

    # (1) tight check against an order-matched folded reference (same bf16 slab).
    ref_s_fold, ref_b_fold = _reference_folded(x, packed)
    np.testing.assert_allclose(np.asarray(scores), np.asarray(ref_s_fold),
                               rtol=1e-4, atol=1e-5)
    np.testing.assert_allclose(np.asarray(bbox_deltas), np.asarray(ref_b_fold),
                               rtol=1e-4, atol=1e-5)

    # (2) loose semantic check against the original un-fused f32 (torch-order) math;
    #     tolerance reflects bf16 inputs/weights and the changed accumulation order.
    ref_s, ref_b = _reference_f32(x, params, scale, training=False)
    np.testing.assert_allclose(np.asarray(scores), np.asarray(ref_s),
                               rtol=5e-2, atol=2e-2)
    np.testing.assert_allclose(np.asarray(bbox_deltas), np.asarray(ref_b),
                               rtol=5e-2, atol=2e-2)

    assert scores.shape == (N, C) and bbox_deltas.shape == (N, 4 * C)

    print("KERNEL_OK")
</pallas_src>

<mosaic_0001>
module attributes {stable_mosaic.version = 11 : i64} {
  func.func @_fpn_predictor_kernel(%arg0: i32, %arg1: memref<16x128xbf16, #tpu.memory_space<vmem>>, %arg2: memref<128x256xbf16, #tpu.memory_space<vmem>>, %arg3: memref<1x256xf32, #tpu.memory_space<vmem>>, %arg4: memref<16x128xf32, #tpu.memory_space<vmem>>, %arg5: memref<16x128xf32, #tpu.memory_space<vmem>>) attributes {dimension_semantics = [#tpu.dimension_semantics<parallel>], iteration_bounds = array<i64: 1>, scalar_prefetch = 0 : i64, scratch_operands = 0 : i64, tpu.core_type = #tpu.core_type<tc>, window_params = [{transform_indices = @transform_0, window_bounds = array<i64: 16, 128>}, {pipeline_mode = #tpu.pipeline_mode<synchronous>, transform_indices = @transform_1, window_bounds = array<i64: 128, 256>}, {pipeline_mode = #tpu.pipeline_mode<synchronous>, transform_indices = @transform_2, window_bounds = array<i64: 1, 256>}, {transform_indices = @transform_3, window_bounds = array<i64: 16, 128>}, {transform_indices = @transform_4, window_bounds = array<i64: 16, 128>}]} {
    %c0 = arith.constant 0 : index
    %c0_0 = arith.constant 0 : index
    %0 = vector.load %arg1[%c0, %c0_0] : memref<16x128xbf16, #tpu.memory_space<vmem>>, vector<16x128xbf16>
    %c0_1 = arith.constant 0 : index
    %c0_2 = arith.constant 0 : index
    %1 = vector.load %arg2[%c0_1, %c0_2] : memref<128x256xbf16, #tpu.memory_space<vmem>>, vector<128x256xbf16>
    %cst = arith.constant dense<0.000000e+00> : vector<16x256xf32>
    %2 = tpu.matmul %0, %1, %cst {dimension_numbers = #tpu.dot_dimension_numbers<[1], [0], [0], [1], [0, 0, 1, 1], [], []>} : vector<16x128xbf16>, vector<128x256xbf16>, vector<16x256xf32> -> vector<16x256xf32>
    %c0_3 = arith.constant 0 : index
    %c0_4 = arith.constant 0 : index
    %3 = vector.load %arg3[%c0_3, %c0_4] : memref<1x256xf32, #tpu.memory_space<vmem>>, vector<1x256xf32>
    %4 = vector.broadcast %3 : vector<1x256xf32> to vector<16x256xf32>
    %5 = arith.addf %2, %4 : vector<16x256xf32>
    %6 = vector.extract_strided_slice %5 {offsets = [0, 0], sizes = [16, 128], strides = [1, 1]} : vector<16x256xf32> to vector<16x128xf32>
    %c0_5 = arith.constant 0 : index
    %c0_6 = arith.constant 0 : index
    %7 = vector.load %arg4[%c0_5, %c0_6] : memref<16x128xf32, #tpu.memory_space<vmem>>, vector<16x128xf32>
    tpu.vector_store %arg4[%c0_5, %c0_6], %6 {strides = array<i32>} : memref<16x128xf32, #tpu.memory_space<vmem>>, vector<16x128xf32>,
    %8 = vector.extract_strided_slice %5 {offsets = [0, 128], sizes = [16, 128], strides = [1, 1]} : vector<16x256xf32> to vector<16x128xf32>
    %c0_7 = arith.constant 0 : index
    %c0_8 = arith.constant 0 : index
    %9 = vector.load %arg5[%c0_7, %c0_8] : memref<16x128xf32, #tpu.memory_space<vmem>>, vector<16x128xf32>
    tpu.vector_store %arg5[%c0_7, %c0_8], %8 {strides = array<i32>} : memref<16x128xf32, #tpu.memory_space<vmem>>, vector<16x128xf32>,
    return
  }
  func.func @transform_0(%arg0: i32) -> (i32, i32) {
    %c0_i32 = arith.constant 0 : i32
    %c0_i32_0 = arith.constant 0 : i32
    return %arg0, %c0_i32 : i32, i32
  }
  func.func @transform_1(%arg0: i32) -> (i32, i32) {
    %c0_i32 = arith.constant 0 : i32
    %c0_i32_0 = arith.constant 0 : i32
    %c0_i32_1 = arith.constant 0 : i32
    return %c0_i32, %c0_i32_0 : i32, i32
  }
  func.func @transform_2(%arg0: i32) -> (i32, i32) {
    %c0_i32 = arith.constant 0 : i32
    %c0_i32_0 = arith.constant 0 : i32
    %c0_i32_1 = arith.constant 0 : i32
    return %c0_i32, %c0_i32_0 : i32, i32
  }
  func.func @transform_3(%arg0: i32) -> (i32, i32) {
    %c0_i32 = arith.constant 0 : i32
    %c0_i32_0 = arith.constant 0 : i32
    return %arg0, %c0_i32 : i32, i32
  }
  func.func @transform_4(%arg0: i32) -> (i32, i32) {
    %c0_i32 = arith.constant 0 : i32
    %c0_i32_0 = arith.constant 0 : i32
    return %arg0, %c0_i32 : i32, i32
  }
}

</mosaic_0001>

<bundles_post_ra>
// kernel: tpu_custom_call.1
= control target key start
LH: loop header
LB: loop body
LE: loop exit
PB: predicated region body
PF: predicated region fallthrough
CT: control target
= control target key end

     0   :  { %10 = vsyncpa [#allocation3], 0  ;;  %s523_s0 = inlined_call_operand.hbm [shape: bf16[16,128], index: 0, kind: input, shape index: {}]   ;;  %s524_s1 = inlined_call_operand.hbm [shape: bf16[128,256], index: 1, kind: input, shape index: {}]   ;;  %s525_s2 = inlined_call_operand.hbm [shape: f32[1,256], index: 2, kind: input, shape index: {}]   ;;  %s526_s3 = inlined_call_operand.hbm [shape: f32[16,128], index: 3, kind: output, shape index: {0}]   ;;  %s527_s4 = inlined_call_operand.hbm [shape: f32[16,128], index: 4, kind: output, shape index: {1}]  }
   0x1   :  { %11 = vsyncpa [#allocation6], 0 }
   0x2   :  { %12 = vsyncpa [#allocation4], 0  ;;  %s31_s17 = sshll.u32 %s524_s1, 4  ;;  %s32_s17 = int_to_ptr.hbm [resolvable:$true] %s31_s17 }
   0x3   :  { %13 = vsyncpa [#allocation10], 0  ;;  %s465_s18 = smov [#allocation5]   ;;  %s18_s22 = sshll.u32 %s523_s0, 4  ;;  %s19_s22 = int_to_ptr.hbm [resolvable:$true] %s18_s22 }
   0x4   :  { %s33_s19 = sshll.u32 %s465_s18, 4  ;;  %s466_s23 = smov 128   ;;  %s34_s19 = int_to_ptr.vmem [resolvable:$true] %s33_s19 }
   0x5   :  { %s467_s24 = smov 8   ;;  %s468_s25 = smov [#allocation2]  }
   0x6   :  { %39 = dma.hbm_to_vmem [thread:$0]  %s32_s17, 2048, %s34_s19, [#allocation6], %s466_s23, %s466_s23, %s467_s24  }
   0x7   :  { %s20_s26 = sshll.u32 %s468_s25, 4  ;;  %s469_s1 = smov 64   ;;  %s21_s26 = int_to_ptr.vmem [resolvable:$true] %s20_s26 }
   0x8   :  { %s470_s27 = smov 4   ;;  %s45_s30 = sshll.u32 %s525_s2, 4  ;;  %s46_s30 = int_to_ptr.hbm [resolvable:$true] %s45_s30 }
   0x9   :  { %26 = dma.hbm_to_vmem [thread:$0]  %s19_s22, 128, %s21_s26, [#allocation3], %s469_s1, %s469_s1, %s470_s27  }
   0xa   :  { %s471_s5 = smov [#allocation7]  }
   0xb   :  { %s47_s0 = sshll.u32 %s471_s5, 4  ;;  %s48_s0 = int_to_ptr.vmem [resolvable:$true] %s47_s0 }
   0xc   :  { %50 = dma.hbm_to_vmem [thread:$0]  %s46_s30, 32, %s48_s0, [#allocation6]  }
   0xd   :  { %457 = dma.done.wait [#allocation3], 128  }
   0xe   :  { %458 = vsyncadd [#allocation3], 4294967168 }
   0xf   :  { %459 = dma.done.wait [#allocation6], 2080  }
  0x10   :  { %460 = vsyncadd [#allocation6], 4294965216  ;;  %v305_v0 = vld [vmem:[#allocation5 + $0x70] sm:$0xf]  ;;  %v327_v1 = vld [vmem:[#allocation5 + $0x74] sm:$0xf0] }
  0x11   :  { %v326_v2 = vld [vmem:[#allocation5 + $0x74] sm:$0xf]  ;;  %v306_v3 = vor.u32 %v327_v1, %v305_v0  ;;  %v307_v4 = vld [vmem:[#allocation5 + $0x78] sm:$0xf0]  ;;  %v297_v5 = vld [vmem:[#allocation5 + $0x60] sm:$0xf] }
  0x12   :  { %v325_v6 = vld [vmem:[#allocation5 + $0x64] sm:$0xf0]  ;;  %v310_v7 = vor.u32 %v326_v2, %v307_v4  ;;  %v324_v8 = vld [vmem:[#allocation5 + $0x64] sm:$0xf]  ;;  %v299_v9 = vld [vmem:[#allocation5 + $0x68] sm:$0xf0] }
  0x13   :  { %173 = vmatpush.bf16.msra.mxu0 %v306_v3  ;;  %v298_v10 = vor.u32 %v325_v6, %v297_v5  ;;  %v302_v11 = vor.u32 %v324_v8, %v299_v9  ;;  %v289_v12 = vld [vmem:[#allocation5 + $0x50] sm:$0xf]  ;;  %v323_v13 = vld [vmem:[#allocation5 + $0x54] sm:$0xf0]  ;;  %v322_v14 = vld [vmem:[#allocation5 + $0x54] sm:$0xf] }
  0x14   :  { %187 = vmatpush.bf16.msra.mxu1 %v310_v7  ;;  %v291_v15 = vld [vmem:[#allocation5 + $0x58] sm:$0xf0]  ;;  %v290_v16 = vor.u32 %v323_v13, %v289_v12  ;;  %v281_v18 = vld [vmem:[#allocation5 + $0x40] sm:$0xf]  ;;  %v321_v19 = vld [vmem:[#allocation5 + $0x44] sm:$0xf0] }
  0x15   :  { %v294_v17 = vor.u32 %v322_v14, %v291_v15  ;;  %v320_v20 = vld [vmem:[#allocation5 + $0x44] sm:$0xf]  ;;  %v283_v21 = vld [vmem:[#allocation5 + $0x48] sm:$0xf0]  ;;  %v282_v22 = vor.u32 %v321_v19, %v281_v18  ;;  %v273_v24 = vld [vmem:[#allocation5 + $0x30] sm:$0xf] }
  0x16   :  { %v286_v23 = vor.u32 %v320_v20, %v283_v21  ;;  %v319_v25 = vld [vmem:[#allocation5 + $0x34] sm:$0xf0]  ;;  %v318_v26 = vld [vmem:[#allocation5 + $0x34] sm:$0xf]  ;;  %v275_v27 = vld [vmem:[#allocation5 + $0x38] sm:$0xf0] }
  0x17   :  { %174 = vmatpush.bf16.msra.mxu0 %v298_v10  ;;  %v274_v28 = vor.u32 %v319_v25, %v273_v24  ;;  %v278_v29 = vor.u32 %v318_v26, %v275_v27  ;;  %v265_v30 = vld [vmem:[#allocation5 + $0x20] sm:$0xf]  ;;  %v317_v31 = vld [vmem:[#allocation5 + $0x24] sm:$0xf0]  ;;  %v316_v32 = vld [vmem:[#allocation5 + $0x24] sm:$0xf] }
  0x18   :  { %188 = vmatpush.bf16.msra.mxu1 %v302_v11  ;;  %v267_v33 = vld [vmem:[#allocation5 + $0x28] sm:$0xf0]  ;;  %v266_v34 = vor.u32 %v317_v31, %v265_v30  ;;  %v257_v36 = vld [vmem:[#allocation5 + $0x10] sm:$0xf]  ;;  %v315_v37 = vld [vmem:[#allocation5 + $0x14] sm:$0xf0] }
  0x19   :  { %v270_v35 = vor.u32 %v316_v32, %v267_v33  ;;  %v314_v38 = vld [vmem:[#allocation5 + $0x14] sm:$0xf]  ;;  %v259_v39 = vld [vmem:[#allocation5 + $0x18] sm:$0xf0]  ;;  %v258_v40 = vor.u32 %v315_v37, %v257_v36  ;;  %v249_v42 = vld [vmem:[#allocation5] sm:$0xf] }
  0x1a   :  { %v262_v41 = vor.u32 %v314_v38, %v259_v39  ;;  %v313_v43 = vld [vmem:[#allocation5 + $0x4] sm:$0xf0]  ;;  %v312_v44 = vld [vmem:[#allocation5 + $0x4] sm:$0xf]  ;;  %v251_v45 = vld [vmem:[#allocation5 + $0x8] sm:$0xf0] }
  0x1b   :  { %175 = vmatpush.bf16.msra.mxu0 %v290_v16  ;;  %v250_v46 = vor.u32 %v313_v43, %v249_v42  ;;  %v254_v47 = vor.u32 %v312_v44, %v251_v45  ;;  %v311_v48 = vld [vmem:[#allocation2] sm:$0xff]  ;;  %v81_v49 = vld [vmem:[#allocation7] sm:$0x3]  ;;  %s472_s2 = smov [#allocation8]   ;;  %s211_s9 = sshll.u32 %s526_s3, 4  ;;  %s212_s9 = int_to_ptr.hbm [resolvable:$true] %s211_s9 }
  0x1c   :  { %189 = vmatpush.bf16.msra.mxu1 %v294_v17  ;;  %v83_v50 = vperm.slane %v81_v49, 0  ;;  %v84_v51 = vperm.slane %v81_v49, 1  ;;  %s209_s6 = sshll.u32 %s472_s2, 4  ;;  %s473_s10 = smov [#allocation9]   ;;  %s210_s6 = int_to_ptr.vmem [resolvable:$true] %s209_s6 }
  0x1d   :  { %s222_s11 = sshll.u32 %s473_s10, 4  ;;  %s224_s14 = sshll.u32 %s527_s4, 4  ;;  %s223_s11 = int_to_ptr.vmem [resolvable:$true] %s222_s11  ;;  %s225_s14 = int_to_ptr.hbm [resolvable:$true] %s224_s14 }
  0x1f   :  { %176 = vmatpush.bf16.msra.mxu0 %v282_v22 }
  0x20   :  { %190 = vmatpush.bf16.msra.mxu1 %v286_v23 }
  0x23   :  { %177 = vmatpush.bf16.msra.mxu0 %v274_v28 }
  0x24   :  { %191 = vmatpush.bf16.msra.mxu1 %v278_v29 }
  0x27   :  { %178 = vmatpush.bf16.msra.mxu0 %v266_v34 }
  0x28   :  { %192 = vmatpush.bf16.msra.mxu1 %v270_v35 }
  0x2b   :  { %179 = vmatpush.bf16.msra.mxu0 %v258_v40 }
  0x2c   :  { %193 = vmatpush.bf16.msra.mxu1 %v262_v41 }
  0x2f   :  { %180 = vmatpush.bf16.msra.mxu0 %v250_v46 }
  0x30   :  { %194 = vmatpush.bf16.msra.mxu1 %v254_v47 }
  0x32   :  { %181 = vmatmul.bf16.vlgmr.msra.gmra.mxu0 %v311_v48 }
  0x33   :  { %195 = vmatmul.bf16.vlgmr.msra.gmra.mxu1 %v311_v48 }
  0xaf   :  { %v182_v52 = vpop.f32.mrf.mxu0 }
  0xb0   :  { %v183_v53 = vadd.f32 %v182_v52, %v83_v50  ;;  %v196_v54 = vpop.f32.mrf.mxu1 }
  0xb1   :  { %v197_v55 = vadd.f32 %v196_v54, %v84_v51 }
  0xb2   :  { %201 = vst [vmem:[#allocation8] sm:$0xff] %v183_v53 }
  0xb3   :  { %203 = vst [vmem:[#allocation9] sm:$0xff] %v197_v55 }
  0xb7   :  { %v184_v56 = vpop.f32.mrf.mxu0 }
  0xb8   :  { %v185_v57 = vadd.f32 %v184_v56, %v83_v50  ;;  %v198_v58 = vpop.f32.mrf.mxu1 }
  0xb9   :  { %v199_v59 = vadd.f32 %v198_v58, %v84_v51 }
  0xba   :  { %202 = vst [vmem:[#allocation8 + $0x8] sm:$0xff] %v185_v57 }
  0xbb   :  { %204 = vst [vmem:[#allocation9 + $0x8] sm:$0xff] %v199_v59  ;;  %217 = dma.vmem_to_hbm [thread:$0]  %s210_s6, 256, %s212_s9, [#allocation4], %s466_s23, %s466_s23, %s467_s24  }
  0xbc   :  { %230 = dma.vmem_to_hbm [thread:$0]  %s223_s11, 256, %s225_s14, [#allocation10], %s466_s23, %s466_s23, %s467_s24  }
  0xbd   :  { %461 = dma.done.wait [#allocation4], 256  }
  0xbe   :  { %462 = vsyncadd [#allocation4], 4294967040 }
  0xbf   :  { %463 = dma.done.wait [#allocation10], 256  }
  0xc0   :  { %464 = vsyncadd [#allocation10], 4294967040 }
  0xc1   :  { %239 = vsyncpa [#allocation3], 1 }
  0xc2   :  { %240 = vsyncpa [#allocation6], 1 }
  0xc3   :  { %241 = vsyncpa [#allocation4], 1 }
  0xc4   :  { %242 = vsyncpa [#allocation10], 1 }

</bundles_post_ra>
